<compile_context>
chip_gen: v6e
topology: v6e:2x2x1
jax: 0.10.0
libtpu: 0.0.40
codegen_flags: <defaults>
</compile_context>

<pallas_src>
import math

import jax
import jax.numpy as jnp
from jax.experimental import pallas as pl
from jax.experimental.pallas import tpu as pltpu

PAD = 2  # universal spatial halo: covers 1x1/3x3/5x5 convs and DeformConv2d's ZeroPad2d(2)


def _round_up(x, m):
    return (x + m - 1) // m * m


# --------------------------------------------------------------------------
# pltpu.roll direction probe (one tiny kernel, run once, cached)
# --------------------------------------------------------------------------
_ROLL_SIGN = None


def _roll_sign():
    global _ROLL_SIGN
    if _ROLL_SIGN is None:
        def k(x_ref, o_ref):
            o_ref[...] = pltpu.roll(x_ref[...], 1, 1)

        x = jnp.broadcast_to(jnp.arange(128, dtype=jnp.float32)[None, :], (8, 128))
        y = pl.pallas_call(k, out_shape=jax.ShapeDtypeStruct((8, 128), jnp.float32))(x)
        v = int(jax.device_get(y)[0, 0])
        # jnp.roll convention => y[0] == x[-1] == 127
        _ROLL_SIGN = 1 if v == 127 else (-1 if v == 1 else 1)
    return _ROLL_SIGN


# --------------------------------------------------------------------------
# In-kernel ops (operate on per-image (C, Mp) values, everything stays in VMEM)
# --------------------------------------------------------------------------
def _shift_lanes(x, s):
    """y[:, m] = x[:, m + s] for interior positions (wrap-around is absorbed by the halo)."""
    if s == 0:
        return x
    amt = (_roll_sign() * (-s)) % x.shape[1]
    if amt == 0:
        return x
    return pltpu.roll(x, amt, 1)


def _kconv(parts, wp, Wp, msk=None, act=None):
    """'Same' conv, stride 1, on zero-haloed padded-flat activations as ONE matmul.

    parts: list of (Cin_i, M) values (channel-concat expressed as a list).
    wp   : {"w": (Cout, k*k*Cin) bf16 (row order = [tap][channel], PyTorch correlation),
            "b": (Cout, 1) f32 or None}
    msk  : (1, M) bf16 interior mask, applied to the INPUT only when k > 1 (so rolls
           never pull stale halo/tail data into the interior).
    """
    xs = [p.astype(jnp.bfloat16) for p in parts]
    xb = xs[0] if len(xs) == 1 else jnp.concatenate(xs, axis=0)
    cin = xb.shape[0]
    kk2 = wp["w"].shape[1]
    T = kk2 // cin
    k = int(round(math.sqrt(T)))
    assert k * k == T and T * cin == kk2, (cin, kk2)
    if k > 1:
        if msk is not None:
            xb = xb * msk
        ph = k // 2
        taps = [_shift_lanes(xb, (t // k - ph) * Wp + (t % k - ph)) for t in range(T)]
        xb = jnp.concatenate(taps, axis=0)           # (k*k*Cin, M) sublane-stacked operand
    acc = jnp.dot(wp["w"], xb, preferred_element_type=jnp.float32)
    if wp["b"] is not None:
        acc = acc + wp["b"]
    if act == "relu":
        acc = jnp.maximum(acc, 0.0)
    return acc


def _k_chain(convs, parts, msk, Wp, act="relu"):
    cur = parts
    for wp in convs:
        cur = [_kconv(cur, wp, Wp, msk, act=act)]
    return cur[0]


def _k_edge(We, x, msk, Wp):
    """Edge_Net.forward: trans -> DB(3) -> rebuilt -> +x (head/tail ResBlocks unused)."""
    t = _kconv([x], We["trans"], Wp, msk)
    feats = [t]
    for dbp in We["db"]:
        feats.append(_kconv(feats, dbp, Wp, msk, act="relu"))
    lff = _kconv(feats, We["lff"], Wp, msk) + t
    reb = _kconv([lff], We["rebuilt"], Wp, msk)
    return x + reb


def _k_chanpool(parts):
    """ChannelPool: cat([max_c, mean_c]) -> (2, M)."""
    x = parts[0] if len(parts) == 1 else jnp.concatenate(parts, axis=0)
    mx = jnp.max(x, axis=0, keepdims=True)
    mn = jnp.sum(x, axis=0, keepdims=True) * (1.0 / x.shape[0])
    return jnp.concatenate([mx, mn], axis=0)


def _k_inorm_relu_sig(x, msk, n_valid):
    """InstanceNorm2d(affine=False, eps=1e-5) -> ReLU -> sigmoid (stats over the interior)."""
    mean = jnp.sum(x * msk, axis=1, keepdims=True) * (1.0 / n_valid)
    cen = x - mean
    var = jnp.sum(cen * cen * msk, axis=1, keepdims=True) * (1.0 / n_valid)
    y = cen * jax.lax.rsqrt(var + 1e-5)
    y = jnp.maximum(y, 0.0)
    return jax.nn.sigmoid(y)


def _k_spatial_attn(wp, parts, msk, Wp, n_valid):
    pooled = _k_chanpool(parts)                                 # (2, M)
    y = _kconv([pooled], wp, Wp, msk)                           # 5x5, no bias, one MXU matmul
    return _k_inorm_relu_sig(y, msk, n_valid)


# --------------------------------------------------------------------------
# Fused segment runner: grid over batch, whole sub-network per image in VMEM
# --------------------------------------------------------------------------
def _const_map(nd):
    return lambda b, _nd=nd: (0,) * _nd


def run_fused(seg_fn, acts, wtree, outs):
    """acts: list of (B, C_i, Mp) arrays; wtree: pytree of small weight arrays
    (constant block index -> fetched once).  outs: list of (channels, dtype).
    seg_fn(act_vals, wtree_vals) -> list of (out_c_j, Mp) f32 values."""
    B, _, Mp = acts[0].shape
    leaves, treedef = jax.tree_util.tree_flatten(wtree)
    arr_pos = [i for i, l in enumerate(leaves) if hasattr(l, "dtype")]
    arr_leaves = [leaves[i] for i in arr_pos]
    n_a, n_w = len(acts), len(arr_leaves)
    out_dtypes = [d for _, d in outs]

    def kernel(*refs):
        a_vals = [refs[i][0] for i in range(n_a)]
        full = list(leaves)
        for j, p in enumerate(arr_pos):
            full[p] = refs[n_a + j][...]
        res = seg_fn(a_vals, jax.tree_util.tree_unflatten(treedef, full))
        for j, o in enumerate(res):
            refs[n_a + n_w + j][0] = o.astype(out_dtypes[j])

    # TODO(synk): weight blocks are revisited with a constant index; they could be
    # single-buffered (pl.Buffered(1)) to halve their VMEM footprint.
    in_specs = ([pl.BlockSpec((1,) + a.shape[1:], lambda b: (b, 0, 0)) for a in acts]
                + [pl.BlockSpec(w.shape, _const_map(w.ndim)) for w in arr_leaves])
    out_specs = [pl.BlockSpec((1, c, Mp), lambda b: (b, 0, 0)) for c, _ in outs]
    out_shape = [jax.ShapeDtypeStruct((B, c, Mp), d) for c, d in outs]
    res = pl.pallas_call(
        kernel,
        grid=(B,),
        in_specs=in_specs,
        out_specs=out_specs,
        out_shape=out_shape,
        compiler_params=pltpu.CompilerParams(
            dimension_semantics=("parallel",),
            vmem_limit_bytes=64 * 1024 * 1024),
    )(*acts, *arr_leaves)
    return list(res)


# --------------------------------------------------------------------------
# Layout helpers + DeformConv2d sampling glue (JAX)
# --------------------------------------------------------------------------
def _geom(H, W):
    Hp, Wp = H + 2 * PAD, W + 2 * PAD
    return Hp, Wp, _round_up(Hp * Wp, 256)     # 256 keeps the MXU N dim unragged on v6e/v7x


def _make_mask(H, W):
    Hp, Wp, Mp = _geom(H, W)
    m = jnp.zeros((Hp, Wp), jnp.float32).at[PAD:PAD + H, PAD:PAD + W].set(1.0)
    m = m.reshape(1, Hp * Wp)
    m = jnp.pad(m, ((0, 0), (0, Mp - Hp * Wp)))
    return m.astype(jnp.bfloat16)              # 0/1 exact in bf16


def to_padded_flat(x_nchw):
    B, C, H, W = x_nchw.shape
    Hp, Wp, Mp = _geom(H, W)
    xp = jnp.pad(x_nchw.astype(jnp.float32), ((0, 0), (0, 0), (PAD, PAD), (PAD, PAD)))
    xf = xp.reshape(B, C, Hp * Wp)
    return jnp.pad(xf, ((0, 0), (0, 0), (0, Mp - Hp * Wp)))


def from_padded_flat(a, H, W):
    B, C, _ = a.shape
    Hp, Wp, _ = _geom(H, W)
    return a[:, :, :Hp * Wp].reshape(B, C, Hp, Wp)[:, :, PAD:PAD + H, PAD:PAD + W]


def deform_prep(a_flat, off_flat, ks, H, W):
    """DeformConv2d bilinear sampling; returns (B, C*ks*ks, Mp) bf16 padded-flat features
    (feature index = c*ks*ks + i*ks + j, matching conv.weight.reshape(O, -1))."""
    B, C, _ = a_flat.shape
    Hp, Wp, Mp = _geom(H, W)
    N = ks * ks
    off = off_flat[:, :, :Hp * Wp].astype(jnp.float32)
    off = off.reshape(B, 2 * N, Hp, Wp)[:, :, PAD:PAD + H, PAD:PAD + W]
    off = jnp.transpose(off, (0, 2, 3, 1))                      # (B,H,W,2N)
    off_x, off_y = off[..., :N], off[..., N:]
    ar = jnp.arange(-(ks - 1) // 2, (ks - 1) // 2 + 1, dtype=jnp.float32)
    dx = jnp.repeat(ar, ks)
    dy = jnp.tile(ar, ks)
    px = (jnp.arange(1, H + 1, dtype=jnp.float32)[None, :, None, None]
          + dx[None, None, None, :] + off_x)
    py = (jnp.arange(1, W + 1, dtype=jnp.float32)[None, None, :, None]
          + dy[None, None, None, :] + off_y)
    x_pad = jnp.transpose(a_flat[:, :, :Hp * Wp].reshape(B, C, Hp, Wp), (0, 2, 3, 1))
    flo_x, flo_y = jnp.floor(px), jnp.floor(py)
    q_lt_x = jnp.clip(flo_x, 0, Hp - 1)
    q_lt_y = jnp.clip(flo_y, 0, Wp - 1)
    q_rb_x = jnp.clip(flo_x + 1, 0, Hp - 1)
    q_rb_y = jnp.clip(flo_y + 1, 0, Wp - 1)
    pcx = jnp.clip(px, 0, Hp - 1)
    pcy = jnp.clip(py, 0, Wp - 1)
    g_lt = (1 + (q_lt_x - pcx)) * (1 + (q_lt_y - pcy))
    g_rb = (1 - (q_rb_x - pcx)) * (1 - (q_rb_y - pcy))
    g_lb = (1 + (q_lt_x - pcx)) * (1 - (q_rb_y - pcy))
    g_rt = (1 - (q_rb_x - pcx)) * (1 + (q_lt_y - pcy))
    x_lin = x_pad.reshape(B, Hp * Wp, C)

    # TODO(synk): the data-dependent bilinear gather stays in plain JAX; fusing it (and the
    # C*ks*ks feature expansion) into the deform-conv Pallas kernel is not attempted here.
    def to_idx(qx, qy):
        return (qx.astype(jnp.int32) * Wp + qy.astype(jnp.int32)).reshape(B, H * W * N)

    idx = jnp.concatenate([to_idx(q_lt_x, q_lt_y), to_idx(q_rb_x, q_rb_y),
                           to_idx(q_lt_x, q_rb_y), to_idx(q_rb_x, q_lt_y)], axis=1)
    g = jnp.take_along_axis(x_lin, idx[:, :, None], axis=1)     # one fused gather (4 corners)
    g = g.reshape(B, 4, H, W, N, C)
    x_off = (g_lt[..., None] * g[:, 0] + g_rb[..., None] * g[:, 1]
             + g_lb[..., None] * g[:, 2] + g_rt[..., None] * g[:, 3])
    feats = jnp.transpose(x_off, (0, 4, 3, 1, 2)).reshape(B, C * N, H, W)
    feats = jnp.pad(feats, ((0, 0), (0, 0), (PAD, PAD), (PAD, PAD))).reshape(B, C * N, Hp * Wp)
    feats = jnp.pad(feats, ((0, 0), (0, 0), (0, Mp - Hp * Wp)))
    return feats.astype(jnp.bfloat16)


# --------------------------------------------------------------------------
# DPN forward
# --------------------------------------------------------------------------
def dpn_forward(params, x_nchw):
    B, _, H, Wd = x_nchw.shape
    Hp, Wp, Mp = _geom(H, Wd)
    nv = float(H * Wd)
    assert PAD >= 2, "halo must cover the largest conv half-width (5x5)"
    bf = jnp.bfloat16

    xf = to_padded_flat(x_nchw)

    # ---- stage 1: dense heads + shared Edge_Net + mv1 offsets (both branches, one kernel) ----
    def seg1(acts, Wt):
        (x,) = acts
        msk = Wt["mask"]
        msk2 = jnp.concatenate([msk, msk], axis=1)
        hm = _k_chain(Wt["mdense1"], [x], msk, Wp)
        dm = _k_chain(Wt["mdense2"], [hm], msk, Wp) + x
        hp = _k_chain(Wt["pdense1"], [x], msk, Wp)
        dp = _k_chain(Wt["pdense2"], [hp], msk, Wp) + x
        # Edge_Net1 + mv1.p_conv are shared by both branches -> lane-concat, one matmul per conv
        d2 = jnp.concatenate([dm, dp], axis=1)                  # (3, 2*Mp)
        e2 = _k_edge(Wt["edge"], d2, msk2, Wp) + d2
        off2 = _kconv([d2], Wt["mv1p"], Wp, msk2)
        return [dm, dp, e2[:, :Mp], e2[:, Mp:], off2[:, :Mp], off2[:, Mp:]]

    w1 = {"mask": params["mask"], "mdense1": params["mdense1"], "mdense2": params["mdense2"],
          "pdense1": params["pdense1"], "pdense2": params["pdense2"], "edge": params["edge"],
          "mv1p": params["mv1"]["p"]}
    md, pd, me, pe, moff1, poff1 = run_fused(
        seg1, [xf], w1, [(3, bf), (3, bf), (3, bf), (3, bf), (50, bf), (50, bf)])

    # ---- deform stack (mv weights shared by both branches, as in the reference forward) ----
    def seg_deform(acts, Wt):
        fm_, fp_ = acts
        # shared weights -> lane-concat the two branches: one MXU matmul per conv
        x2 = jnp.concatenate([fm_, fp_], axis=1)                # (C*25, 2*Mp)
        v2 = _kconv([x2], Wt["dconv"], Wp)                      # deform conv (contraction C*25)
        # deform features have an exact zero halo and dconv has no bias, so v2's halo is
        # already zero -> the 3x3 offset conv needs no input re-mask.
        o2 = _kconv([v2], Wt["pconv"], Wp)
        return [v2[:, :Mp], v2[:, Mp:], o2[:, :Mp], o2[:, Mp:]]

    fm = deform_prep(md, moff1, 5, H, Wd)
    fp = deform_prep(pd, poff1, 5, H, Wd)
    w2 = {"dconv": params["mv1"]["conv"], "pconv": params["mv2"]["p"]}
    vm1, vp1, moff2, poff2 = run_fused(seg_deform, [fm, fp], w2,
                                       [(16, bf), (16, bf), (50, bf), (50, bf)])

    fm = deform_prep(vm1, moff2, 5, H, Wd)
    fp = deform_prep(vp1, poff2, 5, H, Wd)
    w3 = {"dconv": params["mv2"]["conv"], "pconv": params["mv3"]["p"]}
    vm2, vp2, moff3, poff3 = run_fused(seg_deform, [fm, fp], w3,
                                       [(32, bf), (32, bf), (50, bf), (50, bf)])

    fm = deform_prep(vm2, moff3, 5, H, Wd)
    fp = deform_prep(vp2, poff3, 5, H, Wd)

    # ---- stage 3: mv3 + spatial attention / ventral / fusion tail (one kernel) ----
    def seg_tail(acts, Wt):
        fm_, fp_, md_, pd_, me_, pe_ = acts
        msk = Wt["mask"]
        x2 = jnp.concatenate([fm_, fp_], axis=1)                # shared mv3.conv
        v3_2 = _kconv([x2], Wt["mv3c"], Wp)
        mD = v3_2[:, :Mp] + me_ + md_
        pD = v3_2[:, Mp:] + pe_ + pd_

        sa1 = (_k_spatial_attn(Wt["sa1"], [mD], msk, Wp, nv)
               + _kconv([mD], Wt["conv1"], Wp))
        v1 = _k_chain(Wt["ventral1"], [mD, pD], msk, Wp)        # ventralInput = cat(mD, pD)
        sa2 = (_k_spatial_attn(Wt["sa2"], [sa1], msk, Wp, nv)
               + _kconv([sa1], Wt["conv2"], Wp))
        v2 = _k_chain(Wt["ventral2"], [v1, sa1], msk, Wp)       # cat(ventralconv1, sa1)
        sa3 = (_k_spatial_attn(Wt["sa3"], [v2, sa2], msk, Wp, nv)
               + _kconv([v2, sa2], Wt["conv3"], Wp))
        v3 = _k_chain(Wt["ventral3"], [v2], msk, Wp)
        f = _kconv([sa3, v3], Wt["fusion"][0], Wp, act="relu")  # 1x1, no mask needed
        out = _kconv([f], Wt["fusion"][1], Wp, msk, act="relu")
        return [out]

    w4 = {"mask": params["mask"], "mv3c": params["mv3"]["conv"],
          "sa1": params["sa1"], "sa2": params["sa2"], "sa3": params["sa3"],
          "conv1": params["conv1"], "conv2": params["conv2"], "conv3": params["conv3"],
          "ventral1": params["ventral1"], "ventral2": params["ventral2"],
          "ventral3": params["ventral3"], "fusion": params["fusion"]}
    (out,) = run_fused(seg_tail, [fm, fp, md, pd, me, pe], w4, [(3, jnp.float32)])

    return from_padded_flat(out, H, Wd)                          # NCHW output


# --------------------------------------------------------------------------
# Parameters (torch layout) + one-time preparation (transpose/stack/cast)
# --------------------------------------------------------------------------
def make_params():
    base = jax.random.PRNGKey(0)
    cnt = [0]

    def nk():
        cnt[0] += 1
        return jax.random.fold_in(base, cnt[0])

    def conv_p(cin, cout, k, bias=True, zero_w=False, bias_scale=0.02):
        fan_in = cin * k * k
        if zero_w:
            w = jnp.zeros((cout, cin, k, k), jnp.float32)
        else:
            w = jax.random.normal(nk(), (cout, cin, k, k), jnp.float32) * (0.5 / math.sqrt(fan_in))
        b = (jax.random.normal(nk(), (cout,), jnp.float32) * bias_scale) if bias else None
        return {"w": w, "b": b}

    def deform_p(cin, cout, ks=5):
        # p_conv: 3x3 -> 2*ks*ks offsets, weight zero-init (as in __init__), bias kept.
        return {"p": conv_p(cin, 2 * ks * ks, 3, zero_w=True, bias_scale=0.3),
                "conv": conv_p(cin, cout, ks, bias=False)}

    return {
        "mdense1": [conv_p(3, 32, 3), conv_p(32, 32, 3)],
        "pdense1": [conv_p(3, 32, 1), conv_p(32, 32, 3)],
        "mdense2": [conv_p(32, 3, 3), conv_p(3, 3, 3)],
        "pdense2": [conv_p(32, 3, 1), conv_p(3, 3, 3)],
        "edge1": {
            "trans": conv_p(3, 32, 3),
            "db": [conv_p(32, 32, 3), conv_p(64, 32, 3), conv_p(96, 32, 3)],
            "lff": conv_p(128, 32, 1),
            "rebuilt": conv_p(32, 3, 3),
        },
        "mv1": deform_p(3, 16),
        "mv2": deform_p(16, 32),
        "mv3": deform_p(32, 3),
        "sa1": conv_p(2, 3, 5, bias=False),
        "sa2": conv_p(2, 16, 5, bias=False),
        "sa3": conv_p(2, 32, 5, bias=False),
        "conv1": conv_p(3, 3, 1),
        "conv2": conv_p(3, 16, 1),
        "conv3": conv_p(32, 32, 1),
        "ventral1": [conv_p(6, 3, 1), conv_p(3, 3, 3), conv_p(3, 3, 3)],
        "ventral2": [conv_p(6, 16, 1), conv_p(16, 16, 3), conv_p(16, 16, 3)],
        "ventral3": [conv_p(16, 32, 1), conv_p(32, 32, 3), conv_p(32, 32, 3)],
        "fusion": [conv_p(64, 16, 1), conv_p(16, 3, 3)],
    }


def _prep_conv(p):
    """torch (O, Cin, kh, kw) -> (O, kh*kw*Cin) bf16; row order = [tap][channel]
    matching the kernel's sublane-stacked rolled operand."""
    w, b = p["w"], p["b"]
    O, Cin, kh, kw = w.shape
    w2 = jnp.transpose(w, (0, 2, 3, 1)).reshape(O, kh * kw * Cin).astype(jnp.bfloat16)
    bias = None if b is None else b.reshape(O, 1).astype(jnp.float32)
    return {"w": w2, "b": bias}


def _prep_deform(p):
    w = p["w"]                                  # (O, C, ks, ks) -> (O, C*ks*ks)
    O = w.shape[0]
    return {"w": w.reshape(O, -1).astype(jnp.bfloat16), "b": None}


def prepare_params(P, H, W):
    """One-time weight transpose/stack/cast (outside jit) + interior mask."""
    return {
        "mask": _make_mask(H, W),
        "mdense1": [_prep_conv(p) for p in P["mdense1"]],
        "pdense1": [_prep_conv(p) for p in P["pdense1"]],
        "mdense2": [_prep_conv(p) for p in P["mdense2"]],
        "pdense2": [_prep_conv(p) for p in P["pdense2"]],
        "edge": {
            "trans": _prep_conv(P["edge1"]["trans"]),
            "db": [_prep_conv(q) for q in P["edge1"]["db"]],
            "lff": _prep_conv(P["edge1"]["lff"]),
            "rebuilt": _prep_conv(P["edge1"]["rebuilt"]),
        },
        "mv1": {"p": _prep_conv(P["mv1"]["p"]), "conv": _prep_deform(P["mv1"]["conv"])},
        "mv2": {"p": _prep_conv(P["mv2"]["p"]), "conv": _prep_deform(P["mv2"]["conv"])},
        "mv3": {"p": _prep_conv(P["mv3"]["p"]), "conv": _prep_deform(P["mv3"]["conv"])},
        "sa1": _prep_conv(P["sa1"]),
        "sa2": _prep_conv(P["sa2"]),
        "sa3": _prep_conv(P["sa3"]),
        "conv1": _prep_conv(P["conv1"]),
        "conv2": _prep_conv(P["conv2"]),
        "conv3": _prep_conv(P["conv3"]),
        "ventral1": [_prep_conv(p) for p in P["ventral1"]],
        "ventral2": [_prep_conv(p) for p in P["ventral2"]],
        "ventral3": [_prep_conv(p) for p in P["ventral3"]],
        "fusion": [_prep_conv(p) for p in P["fusion"]],
    }


if __name__ == "__main__":
    H = W = 16
    torch_layout_params = make_params()
    _roll_sign()                                    # probe pltpu.roll direction once (cached)
    prepared = prepare_params(torch_layout_params, H, W)
    x = jax.random.normal(jax.random.PRNGKey(0), (2, 3, H, W), jnp.float32)
    fwd = jax.jit(dpn_forward)
    out = fwd(prepared, x)
    jax.block_until_ready(out)
    assert out.shape == (2, 3, H, W), out.shape
    assert bool(jnp.all(jnp.isfinite(out)))
    print("KERNEL_OK")
</pallas_src>

<mosaic_0001>
module attributes {stable_mosaic.version = 11 : i64} {
  func.func @k(%arg0: memref<8x128xf32, #tpu.memory_space<vmem>>, %arg1: memref<8x128xf32, #tpu.memory_space<vmem>>) attributes {dimension_semantics = [], scalar_prefetch = 0 : i64, scratch_operands = 0 : i64, tpu.core_type = #tpu.core_type<tc>} {
    %c0 = arith.constant 0 : index
    %c0_0 = arith.constant 0 : index
    %0 = vector.load %arg0[%c0, %c0_0] : memref<8x128xf32, #tpu.memory_space<vmem>>, vector<8x128xf32>
    %c1_i32 = arith.constant 1 : i32
    %1 = tpu.dynamic_rotate %0 by %c1_i32 dim 1 : vector<8x128xf32>, i32 -> vector<8x128xf32>
    %c0_1 = arith.constant 0 : index
    %c0_2 = arith.constant 0 : index
    %2 = vector.load %arg1[%c0_1, %c0_2] : memref<8x128xf32, #tpu.memory_space<vmem>>, vector<8x128xf32>
    tpu.vector_store %arg1[%c0_1, %c0_2], %1 {strides = array<i32>} : memref<8x128xf32, #tpu.memory_space<vmem>>, vector<8x128xf32>,
    return
  }
}

</mosaic_0001>

<bundles_post_ra>
// kernel: tpu_custom_call.1
= control target key start
LH: loop header
LB: loop body
LE: loop exit
PB: predicated region body
PF: predicated region fallthrough
CT: control target
= control target key end

     0   :  { %6 = vsyncpa [#allocation3], 0  ;;  %s106_s0 = inlined_call_operand.hbm [shape: f32[8,128], index: 0, kind: input, shape index: {}]   ;;  %s107_s1 = inlined_call_operand.hbm [shape: f32[8,128], index: 1, kind: output, shape index: {}]  }
   0x1   :  { %7 = vsyncpa [#allocation4], 0  ;;  %s87_s6 = smov [#allocation2]  }
   0x2   :  { %s14_s7 = sshll.u32 %s87_s6, 4  ;;  %s15_s7 = int_to_ptr.vmem [resolvable:$true] %s14_s7 }
   0x3   :  { %s51_s8 = scalar_lea.vmem %s15_s7, 128  ;;  %p56_p1 = scmp.lt.s32.totalorder %s15_s7, %s15_s7 }
   0x4   :  { %p52_p0 = scmp.ne.s32.totalorder %s15_s7, %s51_s8  ;;  %p57_p2 = scmp.lt.s32.totalorder %s51_s8, %s51_s8 }
   0x6   :  { %p58_p3 = por %p57_p2, %p56_p1 }
   0x8   :  { %p59_p4 = pnand %p58_p3, %p52_p0 }
   0xa   :  { %62 = shalt.err (!%p59_p4)
}
   0xb   :  { %17 = dma.hbm_to_vmem [thread:$0]  %s106_s0, 128, %s15_s7, [#allocation3]  }
   0xc   :  { %83 = dma.done.wait [#allocation3], 128  }
   0xd   :  { %84 = vsyncadd [#allocation3], 4294967168  ;;  %v21_v0 = vld [vmem:[#allocation2] sm:$0xff]  ;;  %s88_s11 = smov 1   ;;  %s89_s12 = smov [#allocation5]  }
   0xe   :  { %22 = vrot.lane.b32.xlu0 %v21_v0, %s88_s11  ;;  %s31_s13 = sshll.u32 %s89_s12, 4  ;;  %s32_s13 = int_to_ptr.vmem [resolvable:$true] %s31_s13 }
   0xf   :  { %s63_s14 = scalar_lea.vmem %s32_s13, 128  ;;  %p68_p6 = scmp.lt.s32.totalorder %s32_s13, %s32_s13 }
  0x10   :  { %p64_p5 = scmp.ne.s32.totalorder %s32_s13, %s63_s14  ;;  %p69_p7 = scmp.lt.s32.totalorder %s63_s14, %s63_s14 }
  0x12   :  { %p70_p8 = por %p69_p7, %p68_p6 }
  0x14   :  { %p71_p9 = pnand %p70_p8, %p64_p5 }
  0x80   :  { %v23_v1 = vpop.permute.xlu0 %22 }
  0x81   :  { %24 = vst [vmem:[#allocation5] sm:$0xff] %v23_v1 }
  0x82   :  { %74 = shalt.err (!%p71_p9)
}
  0x83   :  { %34 = dma.vmem_to_hbm [thread:$0]  %s32_s13, 128, %s107_s1, [#allocation4]  }
  0x84   :  { %85 = dma.done.wait [#allocation4], 128  }
  0x85   :  { %86 = vsyncadd [#allocation4], 4294967168 }
  0x86   :  { %38 = vsyncpa [#allocation3], 1 }
  0x87   :  { %39 = vsyncpa [#allocation4], 1 }

</bundles_post_ra>
